<compile_context>
chip_gen: v6e
topology: v6e:2x2x1
jax: 0.10.0
libtpu: 0.0.40
codegen_flags: <defaults>
</compile_context>

<pallas_src>
import functools

import jax
import jax.numpy as jnp
from jax import lax
from jax.experimental import pallas as pl
from jax.experimental.pallas import tpu as pltpu


def _sa_layer_kernel(c4, x_ref, wqkv_ref, wt_ref, bias_ref, o_ref):
    # x block: (1, c, n) -> (c, n), bf16
    x = x_ref[0]

    # Fused q/k + v projection: one (c4+c, c) @ (c, n) MXU pass, f32 accumulation.
    proj = lax.dot_general(wqkv_ref[...], x, (((1,), (0,)), ((), ())),
                           preferred_element_type=jnp.float32)
    qk = proj[:c4]                                   # shared q/k features (c4, n)
    v = proj[c4:] + bias_ref[:, 0:1]                 # value features + bv   (c, n)

    # energy[i, j] = q_i . k_j (contract channel dim) -> (n, n), f32 accumulation.
    # NOTE: contract-dim-0 on both operands maps to the MXU transposed-lhs path;
    # verify with pl.lower_as_mlir on v6e/v7x if XLU transposes show up.
    qk_b = qk.astype(jnp.bfloat16)
    energy = lax.dot_general(qk_b, qk_b, (((0,), (0,)), ((), ())),
                             preferred_element_type=jnp.float32)

    # Row softmax over keys; reciprocal on the EUP instead of a VALU divide.
    e = jnp.exp(energy - jnp.max(energy, axis=-1, keepdims=True))
    pr = e * pl.reciprocal(jnp.sum(e, axis=-1, keepdims=True), approx=True)

    # PCT column normalization (PyTorch attention.sum(dim=1)); folded into the
    # (c, n) x_r output columns instead of rescaling the (n, n) attention block.
    inv_col = pl.reciprocal(1e-9 + jnp.sum(pr, axis=0, keepdims=True), approx=True)

    # x_r[ch, j] = sum_i v[ch, i] * attn[i, j]  -> (c, n)
    x_r = lax.dot_general(v.astype(jnp.bfloat16), pr.astype(jnp.bfloat16),
                          (((1,), (0,)), ((), ())),
                          preferred_element_type=jnp.float32)
    x_r = x_r * inv_col

    # trans_conv on the offset (x - x_r), BN scale folded into the weight rows,
    # (trans bias + BN shift) fused into bias column 1, then ReLU + residual.
    diff_b = (x_ref[0].astype(jnp.float32) - x_r).astype(jnp.bfloat16)
    t = lax.dot_general(wt_ref[...], diff_b, (((1,), (0,)), ((), ())),
                        preferred_element_type=jnp.float32)
    t = jnp.maximum(t + bias_ref[:, 1:2], 0.0)

    o_ref[0] = (x_ref[0].astype(jnp.float32) + t).astype(o_ref.dtype)


def sa_layer_forward(x, params):
    """x: (b, channels, n) bf16. Returns (b, channels, n) in x.dtype."""
    b, c, n = x.shape
    wqkv, wt, bias = params["wqkv"], params["wt_fold"], params["bias_pack"]
    c4 = wqkv.shape[0] - c

    grid_spec = pltpu.PrefetchScalarGridSpec(
        num_scalar_prefetch=0,
        grid=(b,),
        in_specs=[
            pl.BlockSpec((1, c, n), lambda g: (g, 0, 0)),     # per-batch x tile
            pl.BlockSpec((c4 + c, c), lambda g: (0, 0)),      # packed [Wqk; Wv] (resident)
            pl.BlockSpec((c, c), lambda g: (0, 0)),           # trans weight, BN-folded
            pl.BlockSpec((c, 2), lambda g: (0, 0)),           # [bv, fused shift] packed
        ],
        out_specs=pl.BlockSpec((1, c, n), lambda g: (g, 0, 0)),
    )

    flops = 2 * b * ((c4 + c) * c * n   # fused projection
                     + c4 * n * n       # energy (Gram)
                     + c * n * n        # x_r
                     + c * c * n)       # trans_conv
    bytes_accessed = (2 * b * c * n * x.dtype.itemsize
                      + wqkv.size * wqkv.dtype.itemsize
                      + wt.size * wt.dtype.itemsize
                      + bias.size * bias.dtype.itemsize)
    cost = pl.CostEstimate(flops=flops, transcendentals=b * n * n,
                           bytes_accessed=bytes_accessed)

    return pl.pallas_call(
        functools.partial(_sa_layer_kernel, c4),
        out_shape=jax.ShapeDtypeStruct((b, c, n), x.dtype),
        grid_spec=grid_spec,
        compiler_params=pltpu.CompilerParams(dimension_semantics=("parallel",)),
        cost_estimate=cost,
    )(x, wqkv, wt, bias)


def make_params(key, channels, eps=1e-5):
    """Deterministic synthetic parameters matching SA_Layer.__init__ shapes,
    with the BatchNorm (inference mode) folded into trans_conv and the q/k and
    v projection weights packed into a single (c/4 + c, c) matrix."""
    assert channels % 4 == 0
    c4 = channels // 4
    ks = jax.random.split(key, 9)
    f32 = jnp.float32

    wqk = 0.03 * jax.random.normal(ks[0], (c4, channels), f32)      # tied q/k weight
    wv = 0.1 * jax.random.normal(ks[1], (channels, channels), f32)  # v_conv weight
    bv = 0.1 * jax.random.normal(ks[2], (channels,), f32)           # v_conv bias
    wt = 0.1 * jax.random.normal(ks[3], (channels, channels), f32)  # trans_conv weight
    bt = 0.1 * jax.random.normal(ks[4], (channels,), f32)           # trans_conv bias
    gamma = 1.0 + 0.1 * jax.random.normal(ks[5], (channels,), f32)
    beta = 0.1 * jax.random.normal(ks[6], (channels,), f32)
    mean = 0.05 * jax.random.normal(ks[7], (channels,), f32)
    var = jnp.abs(1.0 + 0.1 * jax.random.normal(ks[8], (channels,), f32))

    scale = gamma / jnp.sqrt(var + eps)
    wt_fold = wt * scale[:, None]                   # fold BN scale into output rows
    shift = bt * scale + beta - mean * scale        # fused conv bias + BN shift

    return {
        "wqkv": jnp.concatenate([wqk, wv], axis=0).astype(jnp.bfloat16),  # (c4+c, c)
        "wt_fold": wt_fold.astype(jnp.bfloat16),
        "bias_pack": jnp.stack([bv, shift], axis=1),                       # (c, 2) f32
    }


def _reference(x, params):
    """Pure-JAX reference matching the PyTorch forward (inference-mode BN),
    with the same bf16 matmul-operand casts as the kernel but exact divides."""
    f32 = jnp.float32
    hi = jax.lax.Precision.HIGHEST
    xf = x.astype(f32)
    wqkv = params["wqkv"].astype(f32)
    wt = params["wt_fold"].astype(f32)
    bv = params["bias_pack"][:, 0]
    sh = params["bias_pack"][:, 1]
    c = wqkv.shape[1]
    c4 = wqkv.shape[0] - c

    proj = jnp.einsum("oc,bcn->bon", wqkv, xf, precision=hi)           # (b, c4+c, n)
    qk = proj[:, :c4]
    v = proj[:, c4:] + bv[None, :, None]

    qk_b = qk.astype(jnp.bfloat16).astype(f32)
    energy = jnp.einsum("bci,bcj->bij", qk_b, qk_b, precision=hi)      # (b, n, n)
    e = jnp.exp(energy - jnp.max(energy, axis=-1, keepdims=True))
    pr = e / jnp.sum(e, axis=-1, keepdims=True)
    inv_col = 1.0 / (1e-9 + jnp.sum(pr, axis=1, keepdims=True))        # (b, 1, n)

    x_r = jnp.einsum("bci,bij->bcj",
                     v.astype(jnp.bfloat16).astype(f32),
                     pr.astype(jnp.bfloat16).astype(f32), precision=hi)
    x_r = x_r * inv_col

    diff_b = (xf - x_r).astype(jnp.bfloat16).astype(f32)
    t = jnp.einsum("oc,bcn->bon", wt, diff_b, precision=hi) + sh[None, :, None]
    return xf + jnp.maximum(t, 0.0)


if __name__ == "__main__":
    b, channels, n = 2, 128, 128       # (batch, channels, points) — MXU/lane aligned

    key = jax.random.PRNGKey(0)
    kx, kp = jax.random.split(key)
    x = jax.random.normal(kx, (b, channels, n), jnp.float32).astype(jnp.bfloat16)
    params = make_params(kp, channels)

    out = jax.block_until_ready(sa_layer_forward(x, params))
    ref = _reference(x, params)

    assert out.shape == (b, channels, n), out.shape
    assert out.dtype == x.dtype, out.dtype
    max_err = float(jnp.max(jnp.abs(out.astype(jnp.float32) - ref)))
    assert jnp.allclose(out.astype(jnp.float32), ref, atol=2e-2, rtol=2e-2), max_err
    print("KERNEL_OK")
</pallas_src>

<mosaic_0001>
module attributes {stable_mosaic.version = 11 : i64} {
  func.func @_sa_layer_kernel(%arg0: i32, %arg1: memref<1x128x128xbf16, #tpu.memory_space<vmem>>, %arg2: memref<160x128xbf16, #tpu.memory_space<vmem>>, %arg3: memref<128x128xbf16, #tpu.memory_space<vmem>>, %arg4: memref<128x2xf32, #tpu.memory_space<vmem>>, %arg5: memref<1x128x128xbf16, #tpu.memory_space<vmem>>) attributes {dimension_semantics = [#tpu.dimension_semantics<parallel>], iteration_bounds = array<i64: 2>, scalar_prefetch = 0 : i64, scratch_operands = 0 : i64, tpu.core_type = #tpu.core_type<tc>, window_params = [{transform_indices = @transform_0, window_bounds = array<i64: 1, 128, 128>}, {pipeline_mode = #tpu.pipeline_mode<synchronous>, transform_indices = @transform_1, window_bounds = array<i64: 160, 128>}, {pipeline_mode = #tpu.pipeline_mode<synchronous>, transform_indices = @transform_2, window_bounds = array<i64: 128, 128>}, {pipeline_mode = #tpu.pipeline_mode<synchronous>, transform_indices = @transform_3, window_bounds = array<i64: 128, 2>}, {transform_indices = @transform_4, window_bounds = array<i64: 1, 128, 128>}]} {
    %c0 = arith.constant 0 : index
    %c0_0 = arith.constant 0 : index
    %c0_1 = arith.constant 0 : index
    %0 = vector.load %arg1[%c0, %c0_0, %c0_1] : memref<1x128x128xbf16, #tpu.memory_space<vmem>>, vector<1x128x128xbf16>
    %1 = vector.shape_cast %0 : vector<1x128x128xbf16> to vector<128x128xbf16>
    %c0_2 = arith.constant 0 : index
    %c0_3 = arith.constant 0 : index
    %2 = vector.load %arg2[%c0_2, %c0_3] : memref<160x128xbf16, #tpu.memory_space<vmem>>, vector<160x128xbf16>
    %cst = arith.constant dense<0.000000e+00> : vector<160x128xf32>
    %3 = tpu.matmul %2, %1, %cst {dimension_numbers = #tpu.dot_dimension_numbers<[1], [0], [0], [1], [0, 0, 1, 1], [], []>} : vector<160x128xbf16>, vector<128x128xbf16>, vector<160x128xf32> -> vector<160x128xf32>
    %4 = vector.extract_strided_slice %3 {offsets = [0, 0], sizes = [32, 128], strides = [1, 1]} : vector<160x128xf32> to vector<32x128xf32>
    %5 = vector.extract_strided_slice %3 {offsets = [32, 0], sizes = [128, 128], strides = [1, 1]} : vector<160x128xf32> to vector<128x128xf32>
    %c0_4 = arith.constant 0 : index
    %c0_5 = arith.constant 0 : index
    %6 = vector.load %arg4[%c0_4, %c0_5] : memref<128x2xf32, #tpu.memory_space<vmem>>, vector<128x1xf32>
    %7 = vector.broadcast %6 : vector<128x1xf32> to vector<128x128xf32>
    %8 = arith.addf %5, %7 : vector<128x128xf32>
    %9 = arith.truncf %4 : vector<32x128xf32> to vector<32x128xbf16>
    %cst_6 = arith.constant dense<0.000000e+00> : vector<128x128xf32>
    %10 = tpu.matmul %9, %9, %cst_6 {dimension_numbers = #tpu.dot_dimension_numbers<[0], [0], [1], [1], [0, 1, 1, 1], [], []>} : vector<32x128xbf16>, vector<32x128xbf16>, vector<128x128xf32> -> vector<128x128xf32>
    %cst_7 = arith.constant dense<0xFF800000> : vector<128xf32>
    %11 = vector.multi_reduction <maximumf>, %10, %cst_7 [1] : vector<128x128xf32> to vector<128xf32>
    %12 = vector.shape_cast %11 : vector<128xf32> to vector<128x1xf32>
    %13 = vector.broadcast %12 : vector<128x1xf32> to vector<128x128xf32>
    %14 = arith.subf %10, %13 : vector<128x128xf32>
    %15 = math.exp %14 : vector<128x128xf32>
    %cst_8 = arith.constant dense<0.000000e+00> : vector<128xf32>
    %16 = vector.multi_reduction <add>, %15, %cst_8 [1] : vector<128x128xf32> to vector<128xf32>
    %17 = vector.shape_cast %16 : vector<128xf32> to vector<128x1xf32>
    %18 = tpu.reciprocal %17 {approx = true} : vector<128x1xf32> -> vector<128x1xf32>
    %19 = vector.broadcast %18 : vector<128x1xf32> to vector<128x128xf32>
    %20 = arith.mulf %15, %19 : vector<128x128xf32>
    %cst_9 = arith.constant dense<0.000000e+00> : vector<128xf32>
    %21 = vector.multi_reduction <add>, %20, %cst_9 [0] : vector<128x128xf32> to vector<128xf32>
    %22 = vector.shape_cast %21 : vector<128xf32> to vector<1x128xf32>
    %cst_10 = arith.constant 9.99999971E-10 : f32
    %23 = vector.broadcast %cst_10 : f32 to vector<1x128xf32>
    %24 = arith.addf %23, %22 : vector<1x128xf32>
    %25 = tpu.reciprocal %24 {approx = true} : vector<1x128xf32> -> vector<1x128xf32>
    %26 = arith.truncf %8 : vector<128x128xf32> to vector<128x128xbf16>
    %27 = arith.truncf %20 : vector<128x128xf32> to vector<128x128xbf16>
    %cst_11 = arith.constant dense<0.000000e+00> : vector<128x128xf32>
    %28 = tpu.matmul %26, %27, %cst_11 {dimension_numbers = #tpu.dot_dimension_numbers<[1], [0], [0], [1], [0, 0, 1, 1], [], []>} : vector<128x128xbf16>, vector<128x128xbf16>, vector<128x128xf32> -> vector<128x128xf32>
    %29 = vector.broadcast %25 : vector<1x128xf32> to vector<128x128xf32>
    %30 = arith.mulf %28, %29 : vector<128x128xf32>
    %c0_12 = arith.constant 0 : index
    %c0_13 = arith.constant 0 : index
    %c0_14 = arith.constant 0 : index
    %31 = vector.load %arg1[%c0_12, %c0_13, %c0_14] : memref<1x128x128xbf16, #tpu.memory_space<vmem>>, vector<1x128x128xbf16>
    %32 = vector.shape_cast %31 : vector<1x128x128xbf16> to vector<128x128xbf16>
    %33 = arith.extf %32 : vector<128x128xbf16> to vector<128x128xf32>
    %34 = arith.subf %33, %30 : vector<128x128xf32>
    %35 = arith.truncf %34 : vector<128x128xf32> to vector<128x128xbf16>
    %c0_15 = arith.constant 0 : index
    %c0_16 = arith.constant 0 : index
    %36 = vector.load %arg3[%c0_15, %c0_16] : memref<128x128xbf16, #tpu.memory_space<vmem>>, vector<128x128xbf16>
    %cst_17 = arith.constant dense<0.000000e+00> : vector<128x128xf32>
    %37 = tpu.matmul %36, %35, %cst_17 {dimension_numbers = #tpu.dot_dimension_numbers<[1], [0], [0], [1], [0, 0, 1, 1], [], []>} : vector<128x128xbf16>, vector<128x128xbf16>, vector<128x128xf32> -> vector<128x128xf32>
    %c0_18 = arith.constant 0 : index
    %c1 = arith.constant 1 : index
    %38 = vector.load %arg4[%c0_18, %c1] : memref<128x2xf32, #tpu.memory_space<vmem>>, vector<128x1xf32>
    %39 = vector.broadcast %38 : vector<128x1xf32> to vector<128x128xf32>
    %40 = arith.addf %37, %39 : vector<128x128xf32>
    %cst_19 = arith.constant 0.000000e+00 : f32
    %41 = vector.broadcast %cst_19 : f32 to vector<128x128xf32>
    %42 = arith.maximumf %40, %41 : vector<128x128xf32>
    %c0_20 = arith.constant 0 : index
    %c0_21 = arith.constant 0 : index
    %c0_22 = arith.constant 0 : index
    %43 = vector.load %arg1[%c0_20, %c0_21, %c0_22] : memref<1x128x128xbf16, #tpu.memory_space<vmem>>, vector<1x128x128xbf16>
    %44 = vector.shape_cast %43 : vector<1x128x128xbf16> to vector<128x128xbf16>
    %45 = arith.extf %44 : vector<128x128xbf16> to vector<128x128xf32>
    %46 = arith.addf %45, %42 : vector<128x128xf32>
    %47 = arith.truncf %46 : vector<128x128xf32> to vector<128x128xbf16>
    %c0_23 = arith.constant 0 : index
    %c0_24 = arith.constant 0 : index
    %c0_25 = arith.constant 0 : index
    %48 = vector.load %arg5[%c0_23, %c0_24, %c0_25] : memref<1x128x128xbf16, #tpu.memory_space<vmem>>, vector<1x128x128xbf16>
    %49 = vector.shape_cast %48 : vector<1x128x128xbf16> to vector<128x128xbf16>
    %50 = vector.shape_cast %47 : vector<128x128xbf16> to vector<1x128x128xbf16>
    tpu.vector_store %arg5[%c0_23, %c0_24, %c0_25], %50 {strides = array<i32>} : memref<1x128x128xbf16, #tpu.memory_space<vmem>>, vector<1x128x128xbf16>,
    return
  }
  func.func @transform_0(%arg0: i32) -> (i32, i32, i32) {
    %c0_i32 = arith.constant 0 : i32
    %c0_i32_0 = arith.constant 0 : i32
    %c0_i32_1 = arith.constant 0 : i32
    return %arg0, %c0_i32, %c0_i32_0 : i32, i32, i32
  }
  func.func @transform_1(%arg0: i32) -> (i32, i32) {
    %c0_i32 = arith.constant 0 : i32
    %c0_i32_0 = arith.constant 0 : i32
    %c0_i32_1 = arith.constant 0 : i32
    return %c0_i32, %c0_i32_0 : i32, i32
  }
  func.func @transform_2(%arg0: i32) -> (i32, i32) {
    %c0_i32 = arith.constant 0 : i32
    %c0_i32_0 = arith.constant 0 : i32
    %c0_i32_1 = arith.constant 0 : i32
    return %c0_i32, %c0_i32_0 : i32, i32
  }
  func.func @transform_3(%arg0: i32) -> (i32, i32) {
    %c0_i32 = arith.constant 0 : i32
    %c0_i32_0 = arith.constant 0 : i32
    %c0_i32_1 = arith.constant 0 : i32
    return %c0_i32, %c0_i32_0 : i32, i32
  }
  func.func @transform_4(%arg0: i32) -> (i32, i32, i32) {
    %c0_i32 = arith.constant 0 : i32
    %c0_i32_0 = arith.constant 0 : i32
    %c0_i32_1 = arith.constant 0 : i32
    return %arg0, %c0_i32, %c0_i32_0 : i32, i32, i32
  }
}

</mosaic_0001>

<bundles_post_ra>
// kernel: tpu_custom_call.1
= control target key start
LH: loop header
LB: loop body
LE: loop exit
PB: predicated region body
PF: predicated region fallthrough
CT: control target
= control target key end

     0   :  { %9 = vsyncpa [#allocation3], 0  ;;  %s2731_s0 = inlined_call_operand.vmem [shape: bf16[2,128,128], index: 0, kind: input, shape index: {}]   ;;  %s2732_s1 = inlined_call_operand.hbm [shape: bf16[160,128], index: 1, kind: input, shape index: {}]   ;;  %s2733_s2 = inlined_call_operand.hbm [shape: bf16[128,128], index: 2, kind: input, shape index: {}]   ;;  %s2734_s3 = inlined_call_operand.vmem [shape: f32[128,2], index: 3, kind: input, shape index: {}]   ;;  %s2735_s4 = inlined_call_operand.hbm [shape: bf16[2,128,128], index: 4, kind: output, shape index: {}]  }
   0x1   :  { %10 = vsyncpa [#allocation6], 0 }
   0x2   :  { %11 = vsyncpa [#allocation4], 0 }
   0x3   :  { %13 = vsyncpa [#allocation4 + $0x1], 0  ;;  %s2160_s15 = smov 0   ;;  %s2162_s16 = smov 0  }
   0x4   :  { %s2164_s17 = smov 0   ;;  %s2166_s18 = smov 0  }
   0x5 LB: > { %s2181_s19 = sadd.s32 4294967295, %s2124_s18   ;;  %s1507_s20 = sadd.s32 4294967294, %s2124_s18   ;;  %s2124_s18 = sphi %s2166_s18, %s2765_s18   ;;  %s2120_s17 = sphi %s2164_s17, %s2764_s17   ;;  %s2116_s16 = sphi %s2162_s16, %s2763_s16   ;;  %s2112_s15 = sphi %s2160_s15, %s2762_s15  }
   0x6   : > { %s2185_s21 = sadd.s32 1, %s2124_s18   ;;  %s115_s22 = sadd.s32 1, %s2120_s17 }
   0x7   : > { %s112_s23 = ssub.s32 %s2124_s18, %s2185_s21  ;;  %p125_p0 = scmp.ne.s32.totalorder %s2120_s17, %s2116_s16 }
   0x8   : > { %p113_p1 = scmp.eq.s32.totalorder %s112_s23, 0  ;;  %p126_p2 = scmp.eq.s32.totalorder %s2181_s19, 1 }
   0x9   : > { %p131_p3 = scmp.ne.s32.totalorder %s2116_s16, %s2112_s15  ;;  %p132_p4 = scmp.eq.s32.totalorder %s1507_s20, 1 }
   0xa   : > { %s2196_s24 = scalar_select %p113_p1, %s2120_s17, %s115_s22  }
   0xb   : > { %p2198_p5 = por %p126_p2, %p125_p0  ;;  %p2202_p6 = por %p132_p4, %p131_p3 }
   0xc   : > { %p1508_p7 = scmp.ge.s32.totalorder %s2124_s18, 1  ;;  %p139_p8 = scmp.lt.s32.totalorder %s2124_s18, 3 }
   0xd   : > { %s2746_s26 = scalar_select %p2202_p6, 1, 0 }
   0xe   : > { %p2736_p9 = scmp.eq.s32.totalorder %s2181_s19, 0  ;;  %p2209_p10 = pnand %p1508_p7, %p139_p8 }
   0xf   : > { %s2126_s28 = smov [#allocation2]   ;;  %s2127_s5 = smov [#allocation5]  }
  0x10   : > { %s151_s29 = sshll.u32 %s2126_s28, 4  ;;  %p1844_p11 = pneg %p2209_p10  ;;  %s152_s29 = int_to_ptr.vmem [resolvable:$true] %s151_s29 }
  0x11   : > { %s164_s6 = sshll.u32 %s2127_s5, 4  ;;  %s2015_s7 = scalar_lea.vmem %s152_s29, 1280  ;;  %s165_s6 = int_to_ptr.vmem [resolvable:$true] %s164_s6 }
  0x12   : > { %p2217_p12 = pnand %p2736_p9, %p1844_p11  ;;  %p2016_p0 = scmp.ne.s32.totalorder %s152_s29, %s2015_s7 }
  0x13   : > { %p2023_p3 = scmp.lt.s32.totalorder %s152_s29, %s152_s29  ;;  %p2024_p4 = scmp.lt.s32.totalorder %s2015_s7, %s2015_s7 }
  0x14   : > { %p2006_p13 = pneg %p2217_p12 }
  0x15   : > { %p2025_p7 = por %p2024_p4, %p2023_p3 }
  0x16   : > { %p2018_p1 = pnand %p2016_p0, %p2006_p13 }
  0x18   : > { %p2019_p2 = pneg %p2018_p1 }
  0x1a   : > { %p2026_p8 = pnand %p2025_p7, %p2019_p2 }
  0x1c   : > { %2029 = shalt.err (!%p2026_p8)
}
  0x1d   : > { %s2128_s8 = smov 64   ;;  %s2129_s9 = smov 4  }
  0x1e   : > { %1847 = dma.hbm_to_vmem [thread:$0]  (!%p2217_p12), %s2732_s1, 1280, %s152_s29, [#allocation3], %s2128_s8, %s2128_s8, %s2129_s9  }
  0x1f   : > { %s2041_s12 = scalar_lea.vmem %s165_s6, 1024  ;;  %p2049_p9 = scmp.lt.s32.totalorder %s165_s6, %s165_s6 }
  0x20   : > { %p2042_p11 = scmp.ne.s32.totalorder %s165_s6, %s2041_s12  ;;  %p2050_p6 = scmp.lt.s32.totalorder %s2041_s12, %s2041_s12 }
  0x22   : > { %p2044_p0 = pnand %p2042_p11, %p2006_p13  ;;  %p2051_p3 = por %p2050_p6, %p2049_p9 }
  0x24   : > { %p2045_p1 = pneg %p2044_p0 }
  0x26   : > { %p2052_p2 = pnand %p2051_p3, %p2045_p1 }
  0x28   : > { %2055 = shalt.err (!%p2052_p2)
}
  0x29   : > { %1850 = dma.hbm_to_vmem [thread:$0]  (!%p2217_p12), %s2733_s2, 1024, %s165_s6, [#allocation6], %s2128_s8, %s2128_s8, %s2129_s9  }
  0x2a   : > { %191 = sbr.rel (%p2209_p10) target bundleno = 1467 (0x5bb), region = 36 }
  0x2f   : > { %p2749_p4 = scmp.eq.s32.totalorder %s2181_s19, 0 }
  0x31   : > { %2099 = dma.done.wait (%p2749_p4), [#allocation3], 1280   ;;  %p2750_p13 = pmov %p2749_p4 }
  0x32   : > { %p2751_p7 = pmov %p2749_p4 }
  0x33   : > { %2101 = vsyncadd (%p2750_p13), [#allocation3], 4294966016 }
  0x34   : > { %2103 = dma.done.wait (%p2751_p7), [#allocation6], 1024   ;;  %p2752_p6 = pmov %p2749_p4 }
  0x35   : > { %p221_p9 = scmp.lt.s32.totalorder %s2181_s19, 1  ;;  %v1912_v3 = vld [vmem:[#allocation2] sm:$0xff]   ;;  %v1913_v9 = vld [vmem:[#allocation2 + $0x8] sm:$0xff]   ;;  %vm614_vm0 = vcmask 261120   ;;  %v1914_v38 = vld [vmem:[#allocation2 + $0x10] sm:$0xff]   ;;  %v2130_v48 = vmov 0  }
  0x36   : > { %2105 = vsyncadd (%p2752_p6), [#allocation6], 4294966272  ;;  %1714 = vmatprep.mubr.bf16.mxu0 %v1912_v3  ;;  %v1915_v39 = vld [vmem:[#allocation2 + $0x18] sm:$0xff]   ;;  %v1916_v40 = vld [vmem:[#allocation2 + $0x20] sm:$0xff]   ;;  %1900 = vset.pattern.permute.xlu1 %v2130_v48  ;;  %s218_s27 = sand.u32 1, %s2116_s16   ;;  %s1590_s30 = sshll.u32 %s2181_s19, 10 }
  0x37   : > { %s222_s20 = scalar_select %p221_p9, %s2181_s19, 1  ;;  %v1917_v41 = vld [vmem:[#allocation2 + $0x28] sm:$0xff]   ;;  %v1918_v44 = vld [vmem:[#allocation2 + $0x30] sm:$0xff]   ;;  %v1919_v45 = vld [vmem:[#allocation2 + $0x38] sm:$0xff]  }
  0x38   : > { %v1920_v46 = vld [vmem:[#allocation2 + $0x40] sm:$0xff]   ;;  %v1921_v47 = vld [vmem:[#allocation2 + $0x48] sm:$0xff]   ;;  %s2681_s7 = scalar_lea.hbm %s2735_s4, %s1590_s30  ;;  %s2691_s8 = scalar_lea.sflag [#allocation4], %s218_s27 }
  0x39   : > { %s1573_s22 = sshll.u32 %s222_s20, 6  ;;  %s2132_s10 = smov [#allocation7]  }
  0x3a   : > { %s225_s28 = scalar_lea.vmem %s2731_s0, %s1573_s22  ;;  %s2060_s11 = sshll.u32 %s2132_s10, 4  ;;  %s2061_s11 = int_to_ptr.vmem [resolvable:$false] %s2060_s11 }
  0x3b   : > { %v2254_v0 = vld [vmem:[%s225_s28 + $0x38] sm:$0xff]   ;;  %v2256_v1 = vld [vmem:[%s225_s28 + $0x30] sm:$0xff]   ;;  %v2258_v2 = vld [vmem:[%s225_s28 + $0x28] sm:$0xff]   ;;  %s2062_s12 = scalar_lea.vmem %s2061_s11, 2048 }
  0x3c   : > { %1698 = vmatprep.subr.bf16.mxu0 %v2254_v0  ;;  %v2262_v4 = vld [vmem:[%s225_s28 + $0x20] sm:$0xff]   ;;  %v2266_v5 = vld [vmem:[%s225_s28 + $0x18] sm:$0xff]   ;;  %v2270_v6 = vld [vmem:[%s225_s28 + $0x10] sm:$0xff]  }
  0x3d   : > { %1699 = vmatpush3.bf16.msra.mxu0 %v2254_v0  ;;  %2753 = vst [vmem:[#allocation11_spill] sm:$0xff] %v2266_v5  ;;  %2754 = vst [vmem:[#allocation12_spill] sm:$0xff] %v2270_v6  ;;  %v2275_v7 = vld [vmem:[%s225_s28 + $0x8] sm:$0xff]   ;;  %v2279_v8 = vld [vmem:[%s225_s28] sm:$0xff]   ;;  %s1515_s28 = sshll.u32 %s218_s27, 6 }
  0x3e   : > { %1700 = vmatprep.subr.bf16.mxu0 %v2256_v1  ;;  %2755 = vst [vmem:[#allocation13_spill] sm:$0xff] %v2275_v7  ;;  %2756 = vst [vmem:[#allocation14_spill] sm:$0xff] %v2279_v8  ;;  %s2653_s29 = scalar_lea.vmem [#allocation7], %s1515_s28 }
  0x3f   : > { %s1423_s5 = sshll.u32 %s2653_s29, 4  ;;  %s2683_s5 = int_to_ptr.vmem [resolvable:$true] %s1423_s5 }
  0x40   : > { %s2056_s9 = scalar_lea.vmem %s2683_s5, 1024  ;;  %p2063_p11 = scmp.lt.s32.totalorder %s2683_s5, %s2061_s11 }
  0x41   : > { %1701 = vmatpush3.bf16.msra.mxu0 %v2256_v1  ;;  %p2057_p10 = scmp.ne.s32.totalorder %s2683_s5, %s2056_s9  ;;  %p2064_p0 = scmp.lt.s32.totalorder %s2062_s12, %s2056_s9 }
  0x42   : > { %1702 = vmatprep.subr.bf16.mxu0 %v2258_v2 }
  0x43   : > { %p2058_p12 = pnand %p2057_p10, %p2198_p5  ;;  %p2065_p1 = por %p2064_p0, %p2063_p11 }
  0x45   : > { %1703 = vmatpush3.bf16.msra.mxu0 %v2258_v2  ;;  %p2059_p8 = pneg %p2058_p12 }
  0x46   : > { %1704 = vmatprep.subr.bf16.mxu0 %v2262_v4 }
  0x47   : > { %p2066_p3 = pnand %p2065_p1, %p2059_p8 }
  0x49   : > { %1705 = vmatpush3.bf16.msra.mxu0 %v2262_v4 }
  0x4a   : > { %1706 = vmatprep.subr.bf16.mxu0 %v2266_v5 }
  0x4d   : > { %1707 = vmatpush3.bf16.msra.mxu0 %v2266_v5 }
  0x4e   : > { %1708 = vmatprep.subr.bf16.mxu0 %v2270_v6 }
  0x51   : > { %1709 = vmatpush3.bf16.msra.mxu0 %v2270_v6 }
  0x52   : > { %1710 = vmatprep.subr.bf16.mxu0 %v2275_v7 }
  0x55   : > { %1711 = vmatpush3.bf16.msra.mxu0 %v2275_v7 }
  0x56   : > { %1712 = vmatprep.subr.bf16.mxu0 %v2279_v8 }
  0x59   : > { %1713 = vmatpush3.bf16.msra.mxu0 %v2279_v8 }
  0x5c   : > { %1715 = vmatmul.mubr.bf16.vlgmr.msra.gmra.mxu0 %v1913_v9 }
  0x5d   : > { %1718 = vmatprep.mubr.bf16.mxu0 %v1914_v38 }
  0x64   : > { %1719 = vmatmul.mubr.bf16.gmra.mxu0 %v1915_v39 }
  0x65   : > { %1722 = vmatprep.mubr.bf16.mxu0 %v1916_v40 }
  0x6c   : > { %1723 = vmatmul.mubr.bf16.gmra.mxu0 %v1917_v41 }
  0x6d   : > { %1726 = vmatprep.mubr.bf16.mxu0 %v1918_v44 }
  0x74   : > { %1727 = vmatmul.mubr.bf16.gmra.mxu0 %v1919_v45 }
  0x75   : > { %1730 = vmatprep.mubr.bf16.mxu0 %v1920_v46 }
  0x7c   : > { %1731 = vmatmul.mubr.bf16.gmra.mxu0 %v1921_v47 }
 0x11c   : > { %v1716_v10 = vpop.f32.mrf.mxu0 }
 0x11e   : > { %v405_v11 = vpop.f32.mrf.mxu0 }
 0x120   : > { %v1717_v12 = vpop.f32.mrf.mxu0 }
 0x121   : > { %v597_v13 = vpack.c.bf16 %v1717_v12, %v1716_v10 }
 0x122   : > { %v408_v14 = vpop.f32.mrf.mxu0 }
 0x123   : > { %v596_v15 = vpack.c.bf16 %v408_v14, %v405_v11  ;;  %1734 = vmatprep.subr.bf16.mxu1 %v597_v13 }
 0x124   : > { %1735 = vmatpush3.bf16.msra.mxu1 %v597_v13 }
 0x125   : > { %598 = vxpose.xlu0.c.b16.start [1/2] (short) %v596_v15, 128  ;;  %1736 = vmatprep.subr.bf16.mxu1 %v596_v15 }
 0x128   : > { %1737 = vmatpush3.bf16.msra.mxu1 %v596_v15 }
 0x129   : > { %599 = vxpose.xlu0.c.b16.end [2/2] (short) %v597_v13, 128 }
 0x132   : > { %1901 = vset.pattern.permute.xlu0 %v2130_v48 }
 0x187   : > { %v606_v16 = vpop.trf.xlu0 }
 0x188   : > { %1738 = vmatprep.mubr.msk.bf16.mxu1 %vm614_vm0, %v606_v16 }
 0x18b   : > { %v607_v17 = vpop.trf.xlu0 }
 0x18c   : > { %1739 = vmatmul.mubr.msk.bf16.vlgmr.msra.gmra.mxu1 %vm614_vm0, %v607_v17 }
 0x18f   : > { %v608_v18 = vpop.trf.xlu0 }
 0x190   : > { %1742 = vmatprep.mubr.msk.bf16.mxu1 %vm614_vm0, %v608_v18 }
 0x193   : > { %v609_v19 = vpop.trf.xlu0 }
 0x194   : > { %1743 = vmatmul.mubr.msk.bf16.gmra.mxu1 %vm614_vm0, %v609_v19 }
 0x197   : > { %v610_v20 = vpop.trf.xlu0 }
 0x198   : > { %1746 = vmatprep.mubr.msk.bf16.mxu1 %vm614_vm0, %v610_v20 }
 0x19b   : > { %v611_v21 = vpop.trf.xlu0 }
 0x19c   : > { %1747 = vmatmul.mubr.msk.bf16.gmra.mxu1 %vm614_vm0, %v611_v21 }
 0x19f   : > { %v612_v22 = vpop.trf.xlu0 }
 0x1a0   : > { %1750 = vmatprep.mubr.msk.bf16.mxu1 %vm614_vm0, %v612_v22 }
 0x1a3   : > { %v613_v23 = vpop.trf.xlu0 }
 0x1a4   : > { %1751 = vmatmul.mubr.msk.bf16.gmra.mxu1 %vm614_vm0, %v613_v23 }
 0x24c   : > { %v2294_v24 = vpop.f32.mrf.mxu1 }
 0x24e   : > { %v2296_v25 = vpop.f32.mrf.mxu1 }
 0x250   : > { %v2298_v26 = vpop.f32.mrf.mxu1 }
 0x252   : > { %v2300_v27 = vpop.f32.mrf.mxu1 }
 0x254   : > { %v2302_v28 = vpop.f32.mrf.mxu1 }
 0x256   : > { %v2304_v29 = vpop.f32.mrf.mxu1 }
 0x258   : > { %v2306_v30 = vpop.f32.mrf.mxu1 }
 0x25a   : > { %v2308_v31 = vpop.f32.mrf.mxu1 }
 0x25c   : > { %v1748_v32 = vpop.f32.mrf.mxu1 }
 0x25e   : > { %v705_v33 = vpop.f32.mrf.mxu1 }
 0x260   : > { %v1749_v34 = vpop.f32.mrf.mxu1 }
 0x262   : > { %v2310_v35 = vpop.f32.mrf.mxu1 }
 0x264   : > { %v1752_v36 = vpop.f32.mrf.mxu1 }
 0x265   : > { %764 = vmax.xlane.f32.xlu1 %v1752_v36 }
 0x266   : > { %v721_v37 = vpop.f32.mrf.mxu1 }
 0x267   : > { %760 = vmax.xlane.f32.xlu0 %v721_v37 }
 0x268   : > { %v1753_v42 = vpop.f32.mrf.mxu1 }
 0x269   : > { %756 = vmax.xlane.f32.xlu1 %v1748_v32 }
 0x26a   : > { %v724_v43 = vpop.f32.mrf.mxu1 }
 0x26b   : > { %742 = vmax.xlane.f32.xlu0 %v2298_v26 }
 0x26d   : > { %758 = vmax.xlane.f32.xlu1 %v1749_v34 }
 0x26f   : > { %738 = vmax.xlane.f32.xlu0 %v2300_v27 }
 0x271   : > { %752 = vmax.xlane.f32.xlu1 %v705_v33 }
 0x275   : > { %754 = vmax.xlane.f32.xlu1 %v2310_v35 }
 0x279   : > { %766 = vmax.xlane.f32.xlu1 %v1753_v42 }
 0x27d   : > { %762 = vmax.xlane.f32.xlu1 %v724_v43 }
 0x281   : > { %748 = vmax.xlane.f32.xlu1 %v2302_v28 }
 0x285   : > { %750 = vmax.xlane.f32.xlu1 %v2306_v30 }
 0x289   : > { %744 = vmax.xlane.f32.xlu1 %v2304_v29 }
 0x28d   : > { %746 = vmax.xlane.f32.xlu1 %v2308_v31 }
 0x291   : > { %740 = vmax.xlane.f32.xlu1 %v2294_v24 }
 0x295   : > { %736 = vmax.xlane.f32.xlu1 %v2296_v25 }
 0x2ee   : > { %v765_v49 = vpop.xlane.xlu1 %764 }
 0x2ef   : > { %v782_v57 = vsub.f32 %v1752_v36, %v765_v49 }
 0x2f0   : > { %v761_v58 = vpop.xlane.xlu0 %760 }
 0x2f1   : > { %v780_v61 = vsub.f32 %v721_v37, %v761_v58  ;;  %v812_v63 = vmul.f32 1.442695, %v782_v57  ;;  %v2381_v57 = vld [vmem:[%s2734_s3] sm:$0xff]  ;;  %v2387_v58 = vld [vmem:[%s2734_s3 + $0x10] sm:$0xff] }
 0x2f2   : > { %v757_v50 = vpop.xlane.xlu1 %756 }
 0x2f3   : > { %v778_v51 = vsub.f32 %v1748_v32, %v757_v50  ;;  %v808_v3 = vmul.f32 1.442695, %v780_v61  ;;  %v2404_v61 = vld [vmem:[%s2734_s3 + $0x48] sm:$0xff] }
 0x2f5   : > { %v804_v52 = vmul.f32 1.442695, %v778_v51 }
 0x2f6   : > { %v759_v53 = vpop.xlane.xlu1 %758 }
 0x2f7   : > { %1938 = vpow2.f32 %v804_v52  ;;  %v779_v54 = vsub.f32 %v1749_v34, %v759_v53  ;;  %v743_v34 = vpop.xlane.xlu0 %742 }
 0x2f9   : > { %v806_v55 = vmul.f32 1.442695, %v779_v54 }
 0x2fa   : > { %v753_v56 = vpop.xlane.xlu1 %752 }
 0x2fb   : > { %1940 = vpow2.f32 %v806_v55  ;;  %v776_v59 = vsub.f32 %v705_v33, %v753_v56  ;;  %v739_v41 = vpop.xlane.xlu0 %738 }
 0x2fc   : > { %v769_v45 = vsub.f32 %v2300_v27, %v739_v41 }
 0x2fd   : > { %v800_v60 = vmul.f32 1.442695, %v776_v59  ;;  %v2392_v59 = vld [vmem:[%s2734_s3 + $0x8] sm:$0xff] }
 0x2fe   : > { %v755_v62 = vpop.xlane.xlu1 %754 }
 0x2ff   : > { %1942 = vpow2.f32 %v800_v60  ;;  %v777_v13 = vsub.f32 %v2310_v35, %v755_v62  ;;  %v2399_v60 = vld [vmem:[%s2734_s3 + $0x18] sm:$0xff]  ;;  %v2411_v62 = vld [vmem:[%s2734_s3 + $0x20] sm:$0xff] }
 0x300   : > { %1944 = vpow2.f32 %v812_v63  ;;  %v2416_v63 = vld [vmem:[%s2734_s3 + $0x58] sm:$0xff] }
 0x301   : > { %1946 = vpow2.f32 %v808_v3  ;;  %v802_v18 = vmul.f32 1.442695, %v777_v13  ;;  %v2423_v3 = vld [vmem:[%s2734_s3 + $0x28] sm:$0xff]  ;;  %v2447_v13 = vld [vmem:[%s2734_s3 + $0x38] sm:$0xff] }
 0x302   : > { %v767_v9 = vpop.xlane.xlu1 %766 }
 0x303   : > { %v783_v10 = vsub.f32 %v1753_v42, %v767_v9  ;;  %v2428_v9 = vld [vmem:[%s2734_s3 + $0x68] sm:$0xff] }
 0x304   : > { %v2321_v11 = vpop.eup %1938 }
 0x305   : > { %v814_v12 = vmul.f32 1.442695, %v783_v10  ;;  %836 = vadd.xlane.f32.xlu1 %v2321_v11  ;;  %v2435_v10 = vld [vmem:[%s2734_s3 + $0x30] sm:$0xff] }
 0x306   : > { %v763_v14 = vpop.xlane.xlu1 %762 }
 0x307   : > { %1948 = vpow2.f32 %v814_v12  ;;  %v781_v15 = vsub.f32 %v724_v43, %v763_v14  ;;  %v2440_v12 = vld [vmem:[%s2734_s3 + $0x78] sm:$0xff]  ;;  %v2453_v14 = vld [vmem:[%s2734_s3 + $0x40] sm:$0xff] }
 0x308   : > { %v2325_v16 = vpop.eup %1940 }
 0x309   : > { %v810_v17 = vmul.f32 1.442695, %v781_v15  ;;  %838 = vadd.xlane.f32.xlu0 %v2325_v16  ;;  %v2459_v15 = vld [vmem:[%s2734_s3 + $0x50] sm:$0xff] }
 0x30a   : > { %v749_v19 = vpop.xlane.xlu1 %748 }
 0x30b   : > { %1950 = vpow2.f32 %v810_v17  ;;  %v774_v20 = vsub.f32 %v2302_v28, %v749_v19  ;;  %v2465_v17 = vld [vmem:[%s2734_s3 + $0x60] sm:$0xff] }
 0x30c   : > { %v2329_v21 = vpop.eup %1942  ;;  %1952 = vpow2.f32 %v802_v18  ;;  %v2471_v18 = vld [vmem:[%s2734_s3 + $0x70] sm:$0xff] }
 0x30d   : > { %v796_v22 = vmul.f32 1.442695, %v774_v20  ;;  %832 = vadd.xlane.f32.xlu1 %v2329_v21  ;;  %v2333_v33 = vpop.eup %1944 }
 0x30e   : > { %v751_v23 = vpop.xlane.xlu1 %750  ;;  %v2336_v37 = vpop.eup %1946 }
 0x30f   : > { %1954 = vpow2.f32 %v796_v22  ;;  %v775_v32 = vsub.f32 %v2306_v30, %v751_v23  ;;  %v771_v30 = vsub.f32 %v2298_v26, %v743_v34 }
 0x311   : > { %v798_v35 = vmul.f32 1.442695, %v775_v32  ;;  %844 = vadd.xlane.f32.xlu1 %v2333_v33 }
 0x312   : > { %v745_v36 = vpop.xlane.xlu1 %744 }
 0x313   : > { %1956 = vpow2.f32 %v798_v35  ;;  %v772_v28 = vsub.f32 %v2304_v29, %v745_v36  ;;  %v790_v29 = vmul.f32 1.442695, %v771_v30  ;;  %v2474_v36 = vpop.f32.mrf.mxu0 }
 0x314   : > { %v2339_v38 = vpop.eup %1948 }
 0x315   : > { %v792_v39 = vmul.f32 1.442695, %v772_v28  ;;  %846 = vadd.xlane.f32.xlu0 %v2339_v38  ;;  %840 = vadd.xlane.f32.xlu1 %v2336_v37  ;;  %v2476_v30 = vpop.f32.mrf.mxu0 }
 0x316   : > { %v747_v40 = vpop.xlane.xlu1 %746 }
 0x317   : > { %1958 = vpow2.f32 %v792_v39  ;;  %v773_v42 = vsub.f32 %v2308_v31, %v747_v40  ;;  %v786_v31 = vmul.f32 1.442695, %v769_v45 }
 0x318   : > { %v2345_v43 = vpop.eup %1950 }
 0x319   : > { %v794_v44 = vmul.f32 1.442695, %v773_v42  ;;  %842 = vadd.xlane.f32.xlu0 %v2345_v43  ;;  %v2349_v47 = vpop.eup %1952 }
 0x31a   : > { %v741_v46 = vpop.xlane.xlu1 %740 }
 0x31b   : > { %1960 = vpow2.f32 %v794_v44  ;;  %v770_v48 = vsub.f32 %v2294_v24, %v741_v46  ;;  %v2478_v44 = vpop.f32.mrf.mxu0 }
 0x31c   : > { %v2352_v26 = vpop.eup %1954  ;;  %1962 = vpow2.f32 %v790_v29 }
 0x31d   : > { %v788_v49 = vmul.f32 1.442695, %v770_v48  ;;  %834 = vadd.xlane.f32.xlu0 %v2349_v47  ;;  %828 = vadd.xlane.f32.xlu1 %v2352_v26 }
 0x31e   : > { %v737_v50 = vpop.xlane.xlu1 %736 }
 0x31f   : > { %1964 = vpow2.f32 %v788_v49  ;;  %v768_v51 = vsub.f32 %v2296_v25, %v737_v50 }
 0x320   : > { %v2357_v27 = vpop.eup %1956  ;;  %1966 = vpow2.f32 %v786_v31 }
 0x321   : > { %v784_v52 = vmul.f32 1.442695, %v768_v51  ;;  %830 = vadd.xlane.f32.xlu0 %v2357_v27 }
 0x323   : > { %1968 = vpow2.f32 %v784_v52  ;;  %v424_v52 = vpop.f32.mrf.mxu0 }
 0x324   : > { %v2360_v24 = vpop.eup %1958 }
 0x325   : > { %824 = vadd.xlane.f32.xlu1 %v2360_v24 }
 0x328   : > { %v2363_v53 = vpop.eup %1960 }
 0x329   : > { %826 = vadd.xlane.f32.xlu0 %v2363_v53  ;;  %v2366_v54 = vpop.eup %1962 }
 0x32c   : > { %v2368_v55 = vpop.eup %1964 }
 0x32d   : > { %822 = vadd.xlane.f32.xlu0 %v2366_v54  ;;  %820 = vadd.xlane.f32.xlu1 %v2368_v55  ;;  %v2372_v25 = vpop.eup %1966 }
 0x330   : > { %v2374_v56 = vpop.eup %1968 }
 0x331   : > { %818 = vadd.xlane.f32.xlu0 %v2372_v25  ;;  %816 = vadd.xlane.f32.xlu1 %v2374_v56 }
 0x342   : > { %502 = vperm.xlu1 %1900, %v2381_v57  }
 0x346   : > { %512 = vperm.xlu1 %1900, %v2387_v58  }
 0x347   : > { %507 = vperm.xlu0 %1901, %v2392_v59  }
 0x34a   : > { %517 = vperm.xlu1 %1900, %v2399_v60  }
 0x34b   : > { %547 = vperm.xlu0 %1901, %v2404_v61  }
 0x34e   : > { %522 = vperm.xlu1 %1900, %v2411_v62  }
 0x34f   : > { %557 = vperm.xlu0 %1901, %v2416_v63  }
 0x352   : > { %527 = vperm.xlu1 %1900, %v2423_v3  }
 0x353   : > { %567 = vperm.xlu0 %1901, %v2428_v9  }
 0x356   : > { %532 = vperm.xlu1 %1900, %v2435_v10  }
 0x357   : > { %577 = vperm.xlu0 %1901, %v2440_v12  }
 0x35a   : > { %537 = vperm.xlu1 %1900, %v2447_v13  }
 0x35e   : > { %542 = vperm.xlu1 %1900, %v2453_v14  }
 0x362   : > { %552 = vperm.xlu1 %1900, %v2459_v15  }
 0x366   : > { %562 = vperm.xlu1 %1900, %v2465_v17  }
 0x36a   : > { %572 = vperm.xlu1 %1900, %v2471_v18  }
 0x38e   : > { %v837_v19 = vpop.xlane.xlu1 %836 }
 0x392   : > { %v839_v22 = vpop.xlane.xlu0 %838 }
 0x396   : > { %v833_v20 = vpop.xlane.xlu1 %832 }
 0x39a   : > { %v845_v23 = vpop.xlane.xlu1 %844 }
 0x39b   : > { %1970 = vrcp.f32 %v845_v23 }
 0x39e   : > { %v847_v32 = vpop.xlane.xlu0 %846  ;;  %v841_v34 = vpop.xlane.xlu1 %840 }
 0x39f   : > { %1972 = vrcp.f32 %v847_v32 }
 0x3a0   : > { %1974 = vrcp.f32 %v839_v22 }
 0x3a1   : > { %1976 = vrcp.f32 %v841_v34 }
 0x3a2   : > { %1978 = vrcp.f32 %v837_v19  ;;  %v843_v35 = vpop.xlane.xlu0 %842 }
 0x3a3   : > { %1980 = vrcp.f32 %v843_v35  ;;  %v2502_v35 = vpop.f32.mrf.mxu0 }
 0x3a4   : > { %1982 = vrcp.f32 %v833_v20 }
 0x3a6   : > { %v835_v28 = vpop.xlane.xlu0 %834  ;;  %v829_v39 = vpop.xlane.xlu1 %828 }
 0x3a7   : > { %1984 = vrcp.f32 %v835_v28 }
 0x3a8   : > { %v1971_v40 = vpop.eup %1970  ;;  %1986 = vrcp.f32 %v829_v39 }
 0x3a9   : > { %v2481_v45 = vmul.f32 %v1971_v40, %v2333_v33 }
 0x3aa   : > { %v831_v41 = vpop.xlane.xlu0 %830 }
 0x3ab   : > { %1988 = vrcp.f32 %v831_v41  ;;  %v437_v41 = vpop.f32.mrf.mxu0 }
 0x3ac   : > { %v1973_v42 = vpop.eup %1972 }
 0x3ad   : > { %v1975_v29 = vpop.eup %1974  ;;  %v2484_v46 = vmul.f32 %v1973_v42, %v2339_v38 }
 0x3ae   : > { %v1977_v48 = vpop.eup %1976  ;;  %v825_v49 = vpop.xlane.xlu1 %824  ;;  %v2495_v33 = vmul.f32 %v1975_v29, %v2325_v16 }
 0x3af   : > { %v1979_v31 = vpop.eup %1978  ;;  %v918_v50 = vpack.c.bf16 %v2484_v46, %v2481_v45  ;;  %1990 = vrcp.f32 %v825_v49  ;;  %v2489_v19 = vmul.f32 %v1977_v48, %v2336_v37 }
 0x3b0   : > { %v1981_v51 = vpop.eup %1980  ;;  %v2500_v32 = vmul.f32 %v1979_v31, %v2321_v11  ;;  %v1725_v31 = vpop.f32.mrf.mxu0 }
 0x3b1   : > { %1754 = vmatprep.subr.bf16.mxu1 %v918_v50  ;;  %v2492_v20 = vmul.f32 %v1981_v51, %v2345_v43  ;;  %v1983_v22 = vpop.eup %1982 }
 0x3b2   : > { %v827_v38 = vpop.xlane.xlu0 %826  ;;  %1755 = vmatpush3.bf16.msra.mxu1 %v918_v50  ;;  %v916_v37 = vpack.c.bf16 %v2495_v33, %v2500_v32  ;;  %v2510_v40 = vmul.f32 %v1983_v22, %v2329_v21  ;;  %v440_v22 = vpop.f32.mrf.mxu0 }
 0x3b3   : > { %1992 = vrcp.f32 %v827_v38  ;;  %v917_v23 = vpack.c.bf16 %v2492_v20, %v2489_v19 }
 0x3b4   : > { %v1985_v34 = vpop.eup %1984 }
 0x3b5   : > { %1756 = vmatprep.subr.bf16.mxu1 %v917_v23  ;;  %v2507_v16 = vmul.f32 %v1985_v34, %v2349_v47  ;;  %v1987_v39 = vpop.eup %1986 }
 0x3b6   : > { %v823_v43 = vpop.xlane.xlu0 %822  ;;  %1757 = vmatpush3.bf16.msra.mxu1 %v917_v23  ;;  %v821_v28 = vpop.xlane.xlu1 %820  ;;  %v870_v49 = vmul.f32 %v1987_v39, %v2352_v26 }
 0x3b7   : > { %1994 = vrcp.f32 %v823_v43  ;;  %1758 = vmatprep.subr.bf16.mxu1 %v916_v37  ;;  %v915_v42 = vpack.c.bf16 %v2507_v16, %v2510_v40 }
 0x3b8   : > { %v1989_v11 = vpop.eup %1988  ;;  %1996 = vrcp.f32 %v821_v28 }
 0x3b9   : > { %v2515_v29 = vmul.f32 %v1989_v11, %v2357_v27  ;;  %v1728_v11 = vpop.f32.mrf.mxu0 }
 0x3ba   : > { %v819_v47 = vpop.xlane.xlu0 %818  ;;  %1759 = vmatpush3.bf16.msra.mxu1 %v916_v37  ;;  %v817_v48 = vpop.xlane.xlu1 %816 }
 0x3bb   : > { %1998 = vrcp.f32 %v819_v47  ;;  %1760 = vmatprep.subr.bf16.mxu1 %v915_v42  ;;  %v914_v21 = vpack.c.bf16 %v2515_v29, %v870_v49 }
 0x3bc   : > { %2000 = vrcp.f32 %v817_v48  ;;  %v1991_v50 = vpop.eup %1990 }
 0x3bd   : > { %v868_v27 = vmul.f32 %v1991_v50, %v2360_v24  ;;  %v453_v50 = vpop.f32.mrf.mxu0 }
 0x3be   : > { %1761 = vmatpush3.bf16.msra.mxu1 %v915_v42  ;;  %v503_v51 = vpop.permute.xlu1 %502 }
 0x3bf   : > { %1762 = vmatprep.subr.bf16.mxu1 %v914_v21  ;;  %v580_v43 = vadd.f32 %v503_v51, %v2476_v30 }
 0x3c0   : > { %v1993_v38 = vpop.eup %1992 }
 0x3c1   : > { %v869_v23 = vmul.f32 %v1993_v38, %v2363_v53 }
 0x3c2   : > { %v508_v34 = vpop.permute.xlu0 %507  ;;  %1763 = vmatpush3.bf16.msra.mxu1 %v914_v21  ;;  %v513_v37 = vpop.permute.xlu1 %512 }
 0x3c3   : > { %v581_v26 = vadd.f32 %v508_v34, %v424_v52  ;;  %v913_v28 = vpack.c.bf16 %v869_v23, %v868_v27  ;;  %v1729_v34 = vpop.f32.mrf.mxu0 }
 0x3c4   : > { %v1995_v39 = vpop.eup %1994 }
 0x3c5   : > { %v1997_v47 = vpop.eup %1996  ;;  %v903_v48 = vpack.c.bf16 %v581_v26, %v580_v43  ;;  %1764 = vmatprep.subr.bf16.mxu1 %v913_v28  ;;  %v867_v42 = vmul.f32 %v1995_v39, %v2366_v54 }
 0x3c6   : > { %1765 = vmatpush3.bf16.msra.mxu1 %v913_v28  ;;  %v518_v8 = vpop.permute.xlu1 %517  ;;  %v866_v24 = vmul.f32 %v1997_v47, %v2368_v55  ;;  %v582_v28 = vadd.f32 %v2474_v36, %v513_v37  ;;  %v548_v5 = vpop.permute.xlu0 %547 }
 0x3c7   : > { %1770 = vmatprep.mubr.bf16.mxu1 %v903_v48  ;;  %v583_v43 = vadd.f32 %v2478_v44, %v518_v8 }
 0x3c8   : > { %v1999_v53 = vpop.eup %1998  ;;  %v912_v21 = vpack.c.bf16 %v867_v42, %v866_v24 }
 0x3c9   : > { %v2001_v38 = vpop.eup %2000  ;;  %v865_v30 = vmul.f32 %v1999_v53, %v2372_v25  ;;  %v904_v7 = vpack.c.bf16 %v583_v43, %v582_v28  ;;  %v456_v25 = vpop.f32.mrf.mxu0 }
 0x3ca   : > { %1766 = vmatprep.subr.bf16.mxu1 %v912_v21  ;;  %v523_v52 = vpop.permute.xlu1 %522  ;;  %v864_v51 = vmul.f32 %v2001_v38, %v2374_v56  ;;  %v589_v43 = vadd.f32 %v548_v5, %v456_v25 }
 0x3cb   : > { %1767 = vmatpush3.bf16.msra.mxu1 %v912_v21  ;;  %v584_v47 = vadd.f32 %v523_v52, %v437_v41  ;;  %v1732_v8 = vpop.f32.mrf.mxu0 }
 0x3cc   : > { %v880_v54 = vadd.f32 %v865_v30, %v864_v51  ;;  %v911_v26 = vpack.c.bf16 %v865_v30, %v864_v51 }
 0x3cd   : > { %v469_v41 = vpop.f32.mrf.mxu0 }
 0x3ce   : > { %v881_v55 = vadd.f32 %v880_v54, %v866_v24  ;;  %1768 = vmatprep.subr.bf16.mxu1 %v911_v26  ;;  %v528_v39 = vpop.permute.xlu1 %527  ;;  %v558_v24 = vpop.permute.xlu0 %557 }
 0x3cf   : > { %1769 = vmatpush3.bf16.msra.mxu1 %v911_v26  ;;  %v585_v48 = vadd.f32 %v528_v39, %v440_v22 }
 0x3d0   : > { %v882_v53 = vadd.f32 %v881_v55, %v867_v42 }
 0x3d1   : > { %v905_v6 = vpack.c.bf16 %v585_v48, %v584_v47 }
 0x3d2   : > { %v883_v56 = vadd.f32 %v882_v53, %v868_v27  ;;  %1771 = vmatmul.mubr.bf16.vlgmr.msra.gmra.mxu1 %v904_v7  ;;  %v533_v21 = vpop.permute.xlu1 %532  ;;  %v1733_v7 = vpop.f32.mrf.mxu0 }
 0x3d3   : > { %1774 = vmatprep.mubr.bf16.mxu1 %v905_v6  ;;  %v586_v36 = vadd.f32 %v2502_v35, %v533_v21  ;;  %v568_v54 = vpop.permute.xlu0 %567  ;;  %v2131_v21 = vmov 1  }
 0x3d4   : > { %v884_v44 = vadd.f32 %v883_v56, %v869_v23  ;;  %v472_v28 = vpop.f32.mrf.mxu0  ;;  %v1922_v56 = vld [vmem:[#allocation5] sm:$0xff]   ;;  %1902 = vset.pattern.permute.xlu1 %v2131_v21  ;;  %1903 = vset.pattern.permute.xlu0 %v2131_v21 }
 0x3d5   : > { %1802 = vmatprep.mubr.bf16.mxu0 %v1922_v56  ;;  %1089 = vperm.xlu1 %1902, %v2381_v57  }
 0x3d6   : > { %v885_v38 = vadd.f32 %v884_v44, %v870_v49  ;;  %v538_v30 = vpop.permute.xlu1 %537  ;;  %1093 = vperm.xlu0 %1903, %v2392_v59  }
 0x3d7   : > { %v587_v37 = vadd.f32 %v1725_v31, %v538_v30  ;;  %v591_v31 = vadd.f32 %v1729_v34, %v558_v24  ;;  %v578_v47 = vpop.permute.xlu0 %577  ;;  %v1046_v30 = vunpack.c.l.bf16 %v2254_v0 }
 0x3d8   : > { %v886_v22 = vadd.f32 %v885_v38, %v2515_v29  ;;  %v595_v34 = vadd.f32 %v1733_v7, %v578_v47  ;;  %v2757_v47 = vld [vmem:[#allocation11_spill] sm:$0xff] }
 0x3d9   : > { %v906_v52 = vpack.c.bf16 %v587_v37, %v586_v36  ;;  %1097 = vperm.xlu1 %1902, %v2387_v58   ;;  %v1047_v36 = vunpack.c.h.bf16 %v2254_v0 }
 0x3da   : > { %v887_v42 = vadd.f32 %v886_v22, %v2510_v40  ;;  %v543_v51 = vpop.permute.xlu1 %542  ;;  %1105 = vperm.xlu0 %1903, %v2411_v62   ;;  %v1044_v22 = vunpack.c.l.bf16 %v2256_v1 }
 0x3db   : > { %v588_v27 = vadd.f32 %v543_v51, %v453_v50  ;;  %1775 = vmatmul.mubr.bf16.gmra.mxu1 %v906_v52  ;;  %v593_v50 = vadd.f32 %v568_v54, %v472_v28  ;;  %v1043_v51 = vunpack.c.h.bf16 %v2258_v2 }
 0x3dc   : > { %v888_v6 = vadd.f32 %v887_v42, %v2507_v16  ;;  %v1045_v42 = vunpack.c.h.bf16 %v2256_v1 }
 0x3dd   : > { %v907_v23 = vpack.c.bf16 %v589_v43, %v588_v27  ;;  %1101 = vperm.xlu1 %1902, %v2399_v60  }
 0x3de   : > { %v889_v49 = vadd.f32 %v888_v6, %v2500_v32  ;;  %v553_v35 = vpop.permute.xlu1 %552  ;;  %1113 = vperm.xlu0 %1903, %v2435_v10  }
 0x3df   : > { %v590_v26 = vadd.f32 %v1728_v11, %v553_v35  ;;  %1778 = vmatprep.mubr.bf16.mxu1 %v907_v23 }
 0x3e0   : > { %v890_v29 = vadd.f32 %v889_v49, %v2495_v33  ;;  %v1042_v49 = vunpack.c.l.bf16 %v2258_v2 }
 0x3e1   : > { %v908_v55 = vpack.c.bf16 %v591_v31, %v590_v26  ;;  %1109 = vperm.xlu1 %1902, %v2423_v3  }
 0x3e2   : > { %v891_v40 = vadd.f32 %v890_v29, %v2489_v19  ;;  %v563_v5 = vpop.permute.xlu1 %562  ;;  %v1923_v19 = vld [vmem:[#allocation5 + $0x20] sm:$0xff]   ;;  %1121 = vperm.xlu0 %1903, %v2453_v14  }
 0x3e3   : > { %v592_v39 = vadd.f32 %v563_v5, %v469_v41  ;;  %1779 = vmatmul.mubr.bf16.gmra.mxu1 %v908_v55  ;;  %v1041_v55 = vunpack.c.h.bf16 %v2262_v4 }
 0x3e4   : > { %v892_v16 = vadd.f32 %v891_v40, %v2492_v20 }
 0x3e5   : > { %v909_v48 = vpack.c.bf16 %v593_v50, %v592_v39  ;;  %1117 = vperm.xlu1 %1902, %v2447_v13   ;;  %v1040_v39 = vunpack.c.l.bf16 %v2262_v4 }
 0x3e6   : > { %v893_v32 = vadd.f32 %v892_v16, %v2481_v45  ;;  %v573_v25 = vpop.permute.xlu1 %572  ;;  %1129 = vperm.xlu0 %1903, %v2459_v15  }
 0x3e7   : > { %v594_v11 = vadd.f32 %v1732_v8, %v573_v25  ;;  %1782 = vmatprep.mubr.bf16.mxu1 %v909_v48  ;;  %v1039_v48 = vunpack.c.h.bf16 %v2757_v47 }
 0x3e8   : > { %v894_v33 = vadd.f32 %v893_v32, %v2484_v46 }
 0x3e9   : > { %v910_v53 = vpack.c.bf16 %v595_v34, %v594_v11  ;;  %1125 = vperm.xlu1 %1902, %v2404_v61   ;;  %v1038_v11 = vunpack.c.l.bf16 %v2757_v47 }
 0x3ea   : > { %1137 = vperm.xlu0 %1903, %v2465_v17   ;;  %v895_v57 = vrot.slane %v894_v33, 4 }
 0x3eb   : > { %1783 = vmatmul.mubr.bf16.gmra.mxu1 %v910_v53 }
 0x3ec   : > { %1810 = vmatprep.mubr.bf16.mxu1 %v1923_v19  ;;  %v896_v58 = vadd.f32 %v895_v57, %v894_v33  ;;  %v2758_v19 = vld [vmem:[#allocation12_spill] sm:$0xff] }
 0x3ed   : > { %1133 = vperm.xlu1 %1902, %v2416_v63   ;;  %v1037_v21 = vunpack.c.h.bf16 %v2758_v19 }
 0x3ee   : > { %1145 = vperm.xlu0 %1903, %v2471_v18   ;;  %v897_v59 = vrot.slane %v896_v58, 2 }
 0x3f0   : > { %v898_v60 = vadd.f32 %v897_v59, %v896_v58 }
 0x3f1   : > { %1141 = vperm.xlu1 %1902, %v2428_v9  }
 0x3f2   : > { %v899_v3 = vrot.slane %v898_v60, 1 }
 0x3f4   : > { %v900_v13 = vadd.f32 %v899_v3, %v898_v60  ;;  %v1036_v60 = vunpack.c.l.bf16 %v2758_v19 }
 0x3f5   : > { %1149 = vperm.xlu1 %1902, %v2440_v12  }
 0x3f6   : > { %v901_v15 = vadd.f32 1e-09, %v900_v13  ;;  %v2759_v13 = vld [vmem:[#allocation13_spill] sm:$0xff] }
 0x3f8   : > { %2002 = vrcp.f32 %v901_v15 }
 0x405   : > { %v2562_v44 = vpop.eup %2002 }
 0x492   : > { %v2554_v62 = vpop.f32.mrf.mxu1 }
 0x494   : > { %v2556_v10 = vpop.f32.mrf.mxu1 }
 0x496   : > { %v2558_v61 = vpop.f32.mrf.mxu1 }
 0x497   : > { %v1019_v3 = vmul.f32 %v2562_v44, %v2558_v61 }
 0x498   : > { %v2560_v14 = vpop.f32.mrf.mxu1 }
 0x49b   : > { %v1776_v63 = vpop.f32.mrf.mxu1 }
 0x49c   : > { %v1022_v34 = vmul.f32 %v2562_v44, %v1776_v63  ;;  %v1035_v63 = vunpack.c.h.bf16 %v2759_v13 }
 0x49d   : > { %v969_v17 = vpop.f32.mrf.mxu1 }
 0x49e   : > { %v1054_v58 = vsub.f32 %v1038_v11, %v1022_v34  ;;  %v1020_v59 = vmul.f32 %v2562_v44, %v969_v17  ;;  %v1034_v17 = vunpack.c.l.bf16 %v2759_v13  ;;  %v1051_v61 = vsub.f32 %v1035_v63, %v1019_v3 }
 0x49f   : > { %v1777_v9 = vpop.f32.mrf.mxu1 }
 0x4a0   : > { %v1023_v16 = vmul.f32 %v2562_v44, %v1777_v9 }
 0x4a1   : > { %v972_v12 = vpop.f32.mrf.mxu1 }
 0x4a2   : > { %v1055_v53 = vsub.f32 %v1039_v48, %v1023_v16  ;;  %v1021_v56 = vmul.f32 %v2562_v44, %v972_v12  ;;  %v1018_v12 = vmul.f32 %v2562_v44, %v2554_v62 }
 0x4a3   : > { %v1780_v18 = vpop.f32.mrf.mxu1 }
 0x4a4   : > { %v1026_v54 = vmul.f32 %v2562_v44, %v1780_v18  ;;  %v1067_v15 = vpack.c.bf16 %v1055_v53, %v1054_v58  ;;  %v1053_v9 = vsub.f32 %v1037_v21, %v1021_v56  ;;  %v1052_v18 = vsub.f32 %v1036_v60, %v1020_v59 }
 0x4a5   : > { %v985_v45 = vpop.f32.mrf.mxu1  ;;  %v1050_v62 = vsub.f32 %v1034_v17, %v1018_v12 }
 0x4a6   : > { %v1058_v5 = vsub.f32 %v1042_v49, %v1026_v54  ;;  %v1024_v50 = vmul.f32 %v2562_v44, %v985_v45  ;;  %v1017_v45 = vmul.f32 %v2562_v44, %v2560_v14 }
 0x4a7   : > { %v1781_v46 = vpop.f32.mrf.mxu1 }
 0x4a8   : > { %v1027_v27 = vmul.f32 %v2562_v44, %v1781_v46  ;;  %v1056_v33 = vsub.f32 %v1040_v39, %v1024_v50  ;;  %v2760_v46 = vld [vmem:[#allocation14_spill] sm:$0xff] }
 0x4a9   : > { %v988_v20 = vpop.f32.mrf.mxu1 }
 0x4aa   : > { %v1059_v29 = vsub.f32 %v1043_v51, %v1027_v27  ;;  %v1025_v28 = vmul.f32 %v2562_v44, %v988_v20  ;;  %v1033_v20 = vunpack.c.h.bf16 %v2760_v46  ;;  %v1927_v27 = vld [vmem:[#allocation5 + $0x30] sm:$0xff]  }
 0x4ab   : > { %v1784_v8 = vpop.f32.mrf.mxu1 }
 0x4ac   : > { %v1030_v37 = vmul.f32 %v2562_v44, %v1784_v8  ;;  %v1069_v32 = vpack.c.bf16 %v1059_v29, %v1058_v5  ;;  %v1057_v25 = vsub.f32 %v1041_v55, %v1025_v28  ;;  %v1066_v8 = vpack.c.bf16 %v1053_v9, %v1052_v18 }
 0x4ad   : > { %v1001_v38 = vpop.f32.mrf.mxu1 }
 0x4ae   : > { %v1028_v41 = vmul.f32 %v2562_v44, %v1001_v38  ;;  %v1062_v7 = vsub.f32 %v1046_v30, %v1030_v37  ;;  %v1068_v57 = vpack.c.bf16 %v1057_v25, %v1056_v33  ;;  %v1016_v38 = vmul.f32 %v2562_v44, %v2556_v10  ;;  %v1924_v10 = vld [vmem:[#allocation5 + $0x8] sm:$0xff]  }
 0x4af   : > { %v1785_v24 = vpop.f32.mrf.mxu1  ;;  %v1032_v37 = vunpack.c.l.bf16 %v2760_v46 }
 0x4b0   : > { %v1031_v52 = vmul.f32 %v2562_v44, %v1785_v24  ;;  %v1060_v35 = vsub.f32 %v1044_v22, %v1028_v41  ;;  %v1065_v24 = vpack.c.bf16 %v1051_v61, %v1050_v62  ;;  %v1049_v41 = vsub.f32 %v1033_v20, %v1017_v45 }
 0x4b1   : > { %v1004_v43 = vpop.f32.mrf.mxu1  ;;  %v1048_v14 = vsub.f32 %v1032_v37, %v1016_v38 }
 0x4b2   : > { %v1063_v6 = vsub.f32 %v1047_v36, %v1031_v52  ;;  %v1029_v23 = vmul.f32 %v2562_v44, %v1004_v43  ;;  %v1925_v44 = vld [vmem:[#allocation5 + $0x28] sm:$0xff]   ;;  %v1926_v43 = vld [vmem:[#allocation5 + $0x10] sm:$0xff]  }
 0x4b3   : > { %v1064_v52 = vpack.c.bf16 %v1049_v41, %v1048_v14 }
 0x4b4   : > { %v1071_v31 = vpack.c.bf16 %v1063_v6, %v1062_v7  ;;  %v1061_v26 = vsub.f32 %v1045_v42, %v1029_v23  ;;  %v1928_v7 = vld [vmem:[#allocation5 + $0x18] sm:$0xff]   ;;  %v1090_v23 = vpop.permute.xlu1 %1089 }
 0x4b5   : > { %v1929_v6 = vld [vmem:[#allocation5 + $0x38] sm:$0xff]  }
 0x4b6   : > { %v1070_v40 = vpack.c.bf16 %v1061_v26, %v1060_v35  ;;  %1786 = vmatprep.subr.bf16.mxu0 %v1071_v31  ;;  %1818 = vmatprep.subr.bf16.mxu1 %v1071_v31  ;;  %v1094_v35 = vpop.permute.xlu0 %1093 }
 0x4b7   : > { %1787 = vmatpush3.bf16.msra.mxu0 %v1071_v31  ;;  %1826 = vmatpush3.bf16.msra.mxu1 %v1071_v31 }
 0x4b8   : > { %1788 = vmatprep.subr.bf16.mxu0 %v1070_v40  ;;  %1819 = vmatprep.subr.bf16.mxu1 %v1070_v40  ;;  %v1098_v54 = vpop.permute.xlu1 %1097 }
 0x4ba   : > { %v1106_v26 = vpop.permute.xlu0 %1105 }
 0x4bb   : > { %1789 = vmatpush3.bf16.msra.mxu0 %v1070_v40  ;;  %1827 = vmatpush3.bf16.msra.mxu1 %v1070_v40 }
 0x4bc   : > { %1790 = vmatprep.subr.bf16.mxu0 %v1069_v32  ;;  %1820 = vmatprep.subr.bf16.mxu1 %v1069_v32  ;;  %v1102_v31 = vpop.permute.xlu1 %1101 }
 0x4be   : > { %v1114_v28 = vpop.permute.xlu0 %1113 }
 0x4bf   : > { %1791 = vmatpush3.bf16.msra.mxu0 %v1069_v32  ;;  %1828 = vmatpush3.bf16.msra.mxu1 %v1069_v32 }
 0x4c0   : > { %1792 = vmatprep.subr.bf16.mxu0 %v1068_v57  ;;  %1821 = vmatprep.subr.bf16.mxu1 %v1068_v57  ;;  %v2632_v29 = vpop.permute.xlu1 %1109 }
 0x4c2   : > { %v1122_v5 = vpop.permute.xlu0 %1121 }
 0x4c3   : > { %1793 = vmatpush3.bf16.msra.mxu0 %v1068_v57  ;;  %1829 = vmatpush3.bf16.msra.mxu1 %v1068_v57 }
 0x4c4   : > { %1794 = vmatprep.subr.bf16.mxu0 %v1067_v15  ;;  %1822 = vmatprep.subr.bf16.mxu1 %v1067_v15  ;;  %v1118_v40 = vpop.permute.xlu1 %1117 }
 0x4c6   : > { %v1130_v16 = vpop.permute.xlu0 %1129 }
 0x4c7   : > { %1795 = vmatpush3.bf16.msra.mxu0 %v1067_v15  ;;  %1830 = vmatpush3.bf16.msra.mxu1 %v1067_v15 }
 0x4c8   : > { %1796 = vmatprep.subr.bf16.mxu0 %v1066_v8  ;;  %1823 = vmatprep.subr.bf16.mxu1 %v1066_v8  ;;  %v1126_v50 = vpop.permute.xlu1 %1125 }
 0x4ca   : > { %v1138_v58 = vpop.permute.xlu0 %1137 }
 0x4cb   : > { %1797 = vmatpush3.bf16.msra.mxu0 %v1066_v8  ;;  %1831 = vmatpush3.bf16.msra.mxu1 %v1066_v8 }
 0x4cc   : > { %1798 = vmatprep.subr.bf16.mxu0 %v1065_v24  ;;  %1824 = vmatprep.subr.bf16.mxu1 %v1065_v24  ;;  %v1134_v34 = vpop.permute.xlu1 %1133 }
 0x4cf   : > { %1799 = vmatpush3.bf16.msra.mxu0 %v1065_v24  ;;  %1832 = vmatpush3.bf16.msra.mxu1 %v1065_v24 }
 0x4d0   : > { %1800 = vmatprep.subr.bf16.mxu0 %v1064_v52  ;;  %1825 = vmatprep.subr.bf16.mxu1 %v1064_v52  ;;  %v1142_v38 = vpop.permute.xlu1 %1141 }
 0x4d3   : > { %1801 = vmatpush3.bf16.msra.mxu0 %v1064_v52  ;;  %1833 = vmatpush3.bf16.msra.mxu1 %v1064_v52 }
 0x4d6   : > { %1803 = vmatmul.mubr.bf16.vlgmr.msra.gmra.mxu0 %v1924_v10  ;;  %1811 = vmatmul.mubr.bf16.vlgmr.msra.gmra.mxu1 %v1925_v44 }
 0x4d7   : > { %1806 = vmatprep.mubr.bf16.mxu0 %v1926_v43  ;;  %1814 = vmatprep.mubr.bf16.mxu1 %v1927_v27 }
 0x4de   : > { %1807 = vmatmul.mubr.bf16.gmra.mxu0 %v1928_v7  ;;  %1815 = vmatmul.mubr.bf16.gmra.mxu1 %v1929_v6  ;;  %v1146_v7 = vpop.permute.xlu0 %1145 }
 0x596   : > { %v1804_v32 = vpop.f32.mrf.mxu0  ;;  %v1812_v25 = vpop.f32.mrf.mxu1 }
 0x597   : > { %v1243_v33 = vadd.f32 %v1804_v32, %v1098_v54  ;;  %v1275_v53 = vadd.f32 %v1812_v25, %v1130_v16 }
 0x598   : > { %v1234_v56 = vpop.f32.mrf.mxu0  ;;  %v1266_v57 = vpop.f32.mrf.mxu1 }
 0x599   : > { %v1235_v59 = vadd.f32 %v1234_v56, %v1090_v23  ;;  %v1267_v3 = vadd.f32 %v1266_v57, %v1122_v5  ;;  %v1299_v12 = vmax.f32 %v1243_v33, 0.0  ;;  %v1307_v18 = vmax.f32 %v1275_v53, 0.0  ;;  %v1150_v56 = vpop.permute.xlu1 %1149 }
 0x59a   : > { %v1805_v15 = vpop.f32.mrf.mxu0  ;;  %v1813_v9 = vpop.f32.mrf.mxu1 }
 0x59b   : > { %v1246_v61 = vadd.f32 %v1805_v15, %v1102_v31  ;;  %v1278_v45 = vadd.f32 %v1813_v9, %v1134_v34  ;;  %v1297_v24 = vmax.f32 %v1235_v59, 0.0  ;;  %v1305_v41 = vmax.f32 %v1267_v3, 0.0 }
 0x59c   : > { %v1237_v8 = vpop.f32.mrf.mxu0  ;;  %v1269_v62 = vpop.f32.mrf.mxu1  ;;  %v1315_v6 = vadd.f32 %v1299_v12, %v1034_v17  ;;  %v1323_v23 = vadd.f32 %v1307_v18, %v1042_v49 }
 0x59d   : > { %v1238_v14 = vadd.f32 %v1237_v8, %v1094_v35  ;;  %v1270_v52 = vadd.f32 %v1269_v62, %v1126_v50  ;;  %v1300_v10 = vmax.f32 %v1246_v61, 0.0  ;;  %v1308_v44 = vmax.f32 %v1278_v45, 0.0 }
 0x59e   : > { %v1808_v43 = vpop.f32.mrf.mxu0  ;;  %v1816_v27 = vpop.f32.mrf.mxu1  ;;  %v1313_v34 = vadd.f32 %v1297_v24, %v1032_v37  ;;  %v1321_v17 = vadd.f32 %v1305_v41, %v1040_v39 }
 0x59f   : > { %v1298_v54 = vmax.f32 %v1238_v14, 0.0  ;;  %v1306_v31 = vmax.f32 %v1270_v52, 0.0  ;;  %v1316_v5 = vadd.f32 %v1300_v10, %v1035_v63  ;;  %v1324_v35 = vadd.f32 %v1308_v44, %v1043_v51 }
 0x5a0   : > { %v1259_v50 = vadd.f32 %v1808_v43, %v1114_v28  ;;  %v1291_v16 = vadd.f32 %v1816_v27, %v1146_v7  ;;  %v1250_v32 = vpop.f32.mrf.mxu0  ;;  %v1282_v25 = vpop.f32.mrf.mxu1 }
 0x5a1   : > { %v1314_v49 = vadd.f32 %v1298_v54, %v1033_v20  ;;  %v1322_v13 = vadd.f32 %v1306_v31, %v1041_v55  ;;  %v1599_v63 = vpack.c.bf16 %v1316_v5, %v1315_v6  ;;  %v1619_v33 = vpack.c.bf16 %v1324_v35, %v1323_v23 }
 0x5a2   : > { %v1251_v2 = vadd.f32 %v1250_v32, %v1106_v26  ;;  %v1283_v51 = vadd.f32 %v1282_v25, %v1138_v58  ;;  %v1809_v28 = vpop.f32.mrf.mxu0  ;;  %v1817_v53 = vpop.f32.mrf.mxu1  ;;  %v1303_v39 = vmax.f32 %v1259_v50, 0.0  ;;  %v1311_v4 = vmax.f32 %v1291_v16, 0.0 }
 0x5a3   : > { %v1594_v57 = vpack.c.bf16 %v1314_v49, %v1313_v34  ;;  %v1614_v59 = vpack.c.bf16 %v1322_v13, %v1321_v17  ;;  %1631 = vst [vmem:[%s2653_s29 + $0x8] sm:$0xff] %v1599_v63   ;;  %1635 = vst [vmem:[%s2653_s29 + $0x28] sm:$0xff] %v1619_v33   ;;  %v1262_v55 = vadd.f32 %v1809_v28, %v1118_v40 }
 0x5a4   : > { %v1294_v46 = vadd.f32 %v1817_v53, %v1150_v56  ;;  %v1253_v20 = vpop.f32.mrf.mxu0  ;;  %v1285_v37 = vpop.f32.mrf.mxu1  ;;  %v1301_v26 = vmax.f32 %v1251_v2, 0.0  ;;  %v1309_v58 = vmax.f32 %v1283_v51, 0.0  ;;  %v1319_v40 = vadd.f32 %v1303_v39, %v1038_v11 }
 0x5a5   : > { %1595 = vst [vmem:[%s2653_s29] sm:$0xff] %v1594_v57   ;;  %1634 = vst [vmem:[%s2653_s29 + $0x20] sm:$0xff] %v1614_v59   ;;  %v1254_v3 = vadd.f32 %v1253_v20, %v2632_v29  ;;  %v1286_v15 = vadd.f32 %v1285_v37, %v1142_v38  ;;  %v1304_v9 = vmax.f32 %v1262_v55, 0.0  ;;  %v1327_v45 = vadd.f32 %v1311_v4, %v1046_v30 }
 0x5a6   : > { %v1312_v12 = vmax.f32 %v1294_v46, 0.0  ;;  %v1317_v62 = vadd.f32 %v1301_v26, %v1036_v60  ;;  %v1325_v38 = vadd.f32 %v1309_v58, %v1044_v22 }
 0x5a7   : > { %v1302_v18 = vmax.f32 %v1254_v3, 0.0  ;;  %v1310_v61 = vmax.f32 %v1286_v15, 0.0  ;;  %v1320_v29 = vadd.f32 %v1304_v9, %v1039_v48 }
 0x5a8   : > { %v1328_v8 = vadd.f32 %v1312_v12, %v1047_v36 }
 0x5a9   : > { %v1318_v11 = vadd.f32 %v1302_v18, %v1037_v21  ;;  %v1326_v30 = vadd.f32 %v1310_v61, %v1045_v42  ;;  %v1609_v47 = vpack.c.bf16 %v1320_v29, %v1319_v40 }
 0x5aa   : > { %v1629_v24 = vpack.c.bf16 %v1328_v8, %v1327_v45 }
 0x5ab   : > { %v1604_v0 = vpack.c.bf16 %v1318_v11, %v1317_v62  ;;  %v1624_v36 = vpack.c.bf16 %v1326_v30, %v1325_v38  ;;  %1633 = vst [vmem:[%s2653_s29 + $0x18] sm:$0xff] %v1609_v47  }
 0x5ac   : > { %1637 = vst [vmem:[%s2653_s29 + $0x38] sm:$0xff] %v1629_v24  }
 0x5ad   : > { %1632 = vst [vmem:[%s2653_s29 + $0x10] sm:$0xff] %v1604_v0   ;;  %1636 = vst [vmem:[%s2653_s29 + $0x30] sm:$0xff] %v1624_v36  }
 0x5ae   : > { %2069 = shalt.err (!%p2066_p3)
}
 0x5af   : > { %s2070_s13 = scalar_lea.hbm %s2681_s7, 1024  ;;  %s2074_s22 = scalar_lea.hbm %s2735_s4, 2048 }
 0x5b0   : > { %p2071_p2 = scmp.ne.s32.totalorder %s2681_s7, %s2070_s13  ;;  %p2075_p7 = scmp.lt.s32.totalorder %s2681_s7, %s2735_s4 }
 0x5b1   : > { %p2076_p6 = scmp.lt.s32.totalorder %s2074_s22, %s2070_s13 }
 0x5b2   : > { %p2072_p4 = pnand %p2071_p2, %p2198_p5 }
 0x5b3   : > { %p2077_p9 = por %p2076_p6, %p2075_p7 }
 0x5b4   : > { %p2073_p13 = pneg %p2072_p4 }
 0x5b6   : > { %p2078_p10 = pnand %p2077_p9, %p2073_p13 }
 0x5b8   : > { %2081 = shalt.err (!%p2078_p10)
}
 0x5b9   : > { %s2133_s28 = smov 64   ;;  %s2134_s29 = smov 4  }
 0x5ba   : > { %1842 = dma.vmem_to_hbm [thread:$0]  (%p2198_p5), %s2683_s5, 1024, %s2681_s7, %s2691_s8, %s2133_s28, %s2133_s28, %s2134_s29  }
 0x5bb PF: > { %p1859_p12 = scmp.ge.s32.totalorder %s2124_s18, 2  ;;  %s1438_s30 = sand.u32 1, %s2112_s15  }
 0x5bc   : > { %p2761_p8 = scmp.ne.s32.totalorder %s2746_s26, 0  ;;  %s1439_s19 = scalar_lea.sflag [#allocation4], %s1438_s30 }
 0x5be   : > { %p1852_p11 = pnand %p1859_p12, %p2761_p8 }
 0x5c0   : > { %p1853_p0 = pneg %p1852_p11 }
 0x5c2   : > { %2107 = dma.done.wait (%p1853_p0), %s1439_s19, 1024  }
 0x5c3   : > { %2109 = vsyncadd (%p1853_p0), %s1439_s19, 4294966272  ;;  %p16_p1 = scmp.ge.s32.totalorder %s2185_s21, 4   ;;  %s2762_s15 = smov %s2116_s16 }
 0x5c4   : > { %s2763_s16 = smov %s2120_s17  ;;  %s2764_s17 = smov %s2196_s24 }
 0x5c5   : > { %s2765_s18 = smov %s2185_s21  ;;  %18 = sbr.rel (!%p16_p1) target bundleno = 5 (0x5), region = 80 }
 0x5ca   :  { %1444 = vsyncpa [#allocation3], 1 }
 0x5cb   :  { %1446 = vsyncpa [#allocation3 + $0x1], 1 }
 0x5cc   :  { %1447 = vsyncpa [#allocation6], 1 }
 0x5cd   :  { %1448 = vsyncpa [#allocation4], 1 }
 0x5ce   :  { %1450 = vsyncpa [#allocation4 + $0x1], 1 }

</bundles_post_ra>
